<compile_context>
chip_gen: v6e
topology: v6e:2x2x1
jax: 0.10.0
libtpu: 0.0.40
codegen_flags: <defaults>
</compile_context>

<pallas_src>
import jax
import jax.numpy as jnp
from jax.experimental import pallas as pl
from jax.experimental.pallas import tpu as pltpu


N_PAD = 128  # lane-dense padded class axis used *inside* the kernel only


def fc_kernel(x_ref, w1_ref, b1_ref, w2_ref, b2_ref, o_ref):
    # x : (tb, 128)   bf16 (or f32)                    -- streamed
    # w1: (128, 64)   same dtype as x                  -- VMEM resident
    # b1: (1, 64)     f32                              -- VMEM resident
    # w2: (64, 128)   f32, zero-padded past `nums`     -- VMEM resident
    # b2: (1, 128)    f32, -inf past `nums`            -- VMEM resident
    # o : (tb, nums)  f32  (narrow store, full-width math inside)
    x = x_ref[...]

    # Linear(128 -> 64) + ReLU; MXU dot accumulates in f32.
    h = jnp.dot(x, w1_ref[...], preferred_element_type=jnp.float32) + b1_ref[...]
    h = jnp.maximum(h, 0.0)

    # Linear(64 -> 128 padded classes); padded lanes get logit = -inf via bias.
    logits = (jnp.dot(h, w2_ref[...], preferred_element_type=jnp.float32)
              + b2_ref[...])

    # Exact softmax over the lane-dense class axis (padded lanes -> exactly 0).
    m = jnp.max(logits, axis=1, keepdims=True)
    e = jnp.exp(logits - m)
    denom = jnp.sum(e, axis=1, keepdims=True)
    probs = e / denom  # exact divide: real rows sum to 1

    # Store only the real classes (block last dim == full array last dim).
    o_ref[...] = probs[:, : o_ref.shape[1]].astype(o_ref.dtype)


def prepare_fc_params(w1, b1, w2, b2, compute_dtype=jnp.bfloat16):
    """One-time preprocessing: PyTorch nn.Linear layout -> kernel layout.

    w1: (64, 128), b1: (64,), w2: (nums, 64), b2: (nums,).
    Returns (w1_t, b1_2d, w2_t, b2_2d); call once at parameter-load time.
    """
    nums = w2.shape[0]
    assert nums <= N_PAD, "class count must fit in one 128-lane tile"
    w1_t = jnp.asarray(w1).astype(compute_dtype).T                  # (128, 64)
    b1_2d = jnp.asarray(b1, jnp.float32)[None, :]                   # (1, 64)
    w2_t = jnp.zeros((64, N_PAD), jnp.float32).at[:, :nums].set(
        jnp.asarray(w2, jnp.float32).T)                             # (64, 128)
    b2_2d = jnp.full((1, N_PAD), -jnp.inf, jnp.float32).at[0, :nums].set(
        jnp.asarray(b2, jnp.float32))                               # (1, 128)
    return w1_t, b1_2d, w2_t, b2_2d


def _pick_tile_b(b_pad, tile_b):
    """Largest multiple of 8 <= min(tile_b, b_pad) that divides b_pad; split
    further so the grid has >= 2 steps when possible (v7x megacore)."""
    cap = max(8, (min(tile_b, b_pad) // 8) * 8)
    tb = 8
    for cand in range(cap, 7, -8):
        if b_pad % cand == 0:
            tb = cand
            break
    if b_pad // tb < 2 and b_pad >= 16:
        half_cap = ((b_pad // 2) // 8) * 8
        for cand in range(half_cap, 7, -8):
            if b_pad % cand == 0:
                tb = cand
                break
    return tb


def fc_forward(E, w1_t, b1_2d, w2_t, b2_2d, *, nums, tile_b=2048):
    """E: (B, 128).  Params from prepare_fc_params.  Returns (B, nums) f32 probs."""
    B, D = E.shape
    assert D == 128
    compute_dtype = w1_t.dtype

    # Pad batch only to a sublane multiple (8); no full-array pad when aligned.
    B_pad = ((B + 7) // 8) * 8
    x = E.astype(compute_dtype)
    if B_pad != B:
        x = jnp.pad(x, ((0, B_pad - B), (0, 0)))

    tb = _pick_tile_b(B_pad, tile_b)

    out = pl.pallas_call(
        fc_kernel,
        out_shape=jax.ShapeDtypeStruct((B_pad, nums), jnp.float32),
        grid=(B_pad // tb,),
        in_specs=[
            pl.BlockSpec((tb, 128), lambda i: (i, 0)),      # E tile (streamed)
            pl.BlockSpec((128, 64), lambda i: (0, 0)),      # w1 (resident)
            pl.BlockSpec((1, 64), lambda i: (0, 0)),        # b1 (resident)
            pl.BlockSpec((64, N_PAD), lambda i: (0, 0)),    # w2 (resident)
            pl.BlockSpec((1, N_PAD), lambda i: (0, 0)),     # b2 (resident)
        ],
        out_specs=pl.BlockSpec((tb, nums), lambda i: (i, 0)),
        compiler_params=pltpu.CompilerParams(
            dimension_semantics=("parallel",)),
    )(x, w1_t, b1_2d, w2_t, b2_2d)

    return out if B_pad == B else out[:B]


def fc_reference(E, w1, b1, w2, b2):
    h = jnp.maximum(E @ w1.T + b1, 0.0)
    logits = h @ w2.T + b2
    return jax.nn.softmax(logits, axis=1)


if __name__ == "__main__":
    key = jax.random.PRNGKey(0)
    k_x, k_w1, k_b1, k_w2, k_b2 = jax.random.split(key, 5)

    B = 8
    nums = 7

    # Deterministic synthetic parameters (PyTorch nn.Linear shapes).
    E  = jax.random.normal(k_x,  (B, 128), dtype=jnp.float32)
    w1 = jax.random.normal(k_w1, (64, 128), dtype=jnp.float32) * 0.05
    b1 = jax.random.normal(k_b1, (64,),     dtype=jnp.float32) * 0.05
    w2 = jax.random.normal(k_w2, (nums, 64), dtype=jnp.float32) * 0.05
    b2 = jax.random.normal(k_b2, (nums,),    dtype=jnp.float32) * 0.05

    # One-time parameter prep (hoisted out of the per-call path).
    params = prepare_fc_params(w1, b1, w2, b2, compute_dtype=jnp.bfloat16)

    fc = jax.jit(fc_forward, static_argnames=("nums", "tile_b"))
    out = fc(E, *params, nums=nums)
    out = jax.block_until_ready(out)

    ref = fc_reference(E, w1, b1, w2, b2)
    assert out.shape == (B, nums)
    # Tolerance covers the bf16 cast of E / w1 feeding the first MXU matmul.
    assert jnp.allclose(out, ref, atol=1e-2, rtol=1e-2), "mismatch vs reference"
    # Exact softmax divide: rows sum to 1 (padded classes contribute exactly 0).
    assert jnp.allclose(jnp.sum(out, axis=1), jnp.ones((B,)), atol=1e-5)

    print("KERNEL_OK")
</pallas_src>

<mosaic_0001>
module attributes {stable_mosaic.version = 11 : i64} {
  func.func @fc_kernel(%arg0: i32, %arg1: memref<8x128xbf16, #tpu.memory_space<vmem>>, %arg2: memref<128x64xbf16, #tpu.memory_space<vmem>>, %arg3: memref<1x64xf32, #tpu.memory_space<vmem>>, %arg4: memref<64x128xf32, #tpu.memory_space<vmem>>, %arg5: memref<1x128xf32, #tpu.memory_space<vmem>>, %arg6: memref<8x7xf32, #tpu.memory_space<vmem>>) attributes {dimension_semantics = [#tpu.dimension_semantics<parallel>], iteration_bounds = array<i64: 1>, scalar_prefetch = 0 : i64, scratch_operands = 0 : i64, tpu.core_type = #tpu.core_type<tc>, window_params = [{transform_indices = @transform_0, window_bounds = array<i64: 8, 128>}, {pipeline_mode = #tpu.pipeline_mode<synchronous>, transform_indices = @transform_1, window_bounds = array<i64: 128, 64>}, {pipeline_mode = #tpu.pipeline_mode<synchronous>, transform_indices = @transform_2, window_bounds = array<i64: 1, 64>}, {pipeline_mode = #tpu.pipeline_mode<synchronous>, transform_indices = @transform_3, window_bounds = array<i64: 64, 128>}, {pipeline_mode = #tpu.pipeline_mode<synchronous>, transform_indices = @transform_4, window_bounds = array<i64: 1, 128>}, {transform_indices = @transform_5, window_bounds = array<i64: 8, 7>}]} {
    %c0 = arith.constant 0 : index
    %c0_0 = arith.constant 0 : index
    %0 = vector.load %arg1[%c0, %c0_0] : memref<8x128xbf16, #tpu.memory_space<vmem>>, vector<8x128xbf16>
    %c0_1 = arith.constant 0 : index
    %c0_2 = arith.constant 0 : index
    %1 = vector.load %arg2[%c0_1, %c0_2] : memref<128x64xbf16, #tpu.memory_space<vmem>>, vector<128x64xbf16>
    %cst = arith.constant dense<0.000000e+00> : vector<8x64xf32>
    %2 = tpu.matmul %0, %1, %cst {dimension_numbers = #tpu.dot_dimension_numbers<[1], [0], [0], [1], [0, 0, 1, 1], [], []>} : vector<8x128xbf16>, vector<128x64xbf16>, vector<8x64xf32> -> vector<8x64xf32>
    %c0_3 = arith.constant 0 : index
    %c0_4 = arith.constant 0 : index
    %3 = vector.load %arg3[%c0_3, %c0_4] : memref<1x64xf32, #tpu.memory_space<vmem>>, vector<1x64xf32>
    %4 = vector.broadcast %3 : vector<1x64xf32> to vector<8x64xf32>
    %5 = arith.addf %2, %4 : vector<8x64xf32>
    %cst_5 = arith.constant 0.000000e+00 : f32
    %6 = vector.broadcast %cst_5 : f32 to vector<8x64xf32>
    %7 = arith.maximumf %5, %6 : vector<8x64xf32>
    %c0_6 = arith.constant 0 : index
    %c0_7 = arith.constant 0 : index
    %8 = vector.load %arg4[%c0_6, %c0_7] : memref<64x128xf32, #tpu.memory_space<vmem>>, vector<64x128xf32>
    %cst_8 = arith.constant dense<0.000000e+00> : vector<8x128xf32>
    %9 = tpu.matmul %7, %8, %cst_8 {dimension_numbers = #tpu.dot_dimension_numbers<[1], [0], [0], [1], [0, 0, 1, 1], [], []>} : vector<8x64xf32>, vector<64x128xf32>, vector<8x128xf32> -> vector<8x128xf32>
    %c0_9 = arith.constant 0 : index
    %c0_10 = arith.constant 0 : index
    %10 = vector.load %arg5[%c0_9, %c0_10] : memref<1x128xf32, #tpu.memory_space<vmem>>, vector<1x128xf32>
    %11 = vector.broadcast %10 : vector<1x128xf32> to vector<8x128xf32>
    %12 = arith.addf %9, %11 : vector<8x128xf32>
    %cst_11 = arith.constant dense<0xFF800000> : vector<8xf32>
    %13 = vector.multi_reduction <maximumf>, %12, %cst_11 [1] : vector<8x128xf32> to vector<8xf32>
    %14 = vector.shape_cast %13 : vector<8xf32> to vector<8x1xf32>
    %15 = vector.broadcast %14 : vector<8x1xf32> to vector<8x128xf32>
    %16 = arith.subf %12, %15 : vector<8x128xf32>
    %17 = math.exp %16 : vector<8x128xf32>
    %cst_12 = arith.constant dense<0.000000e+00> : vector<8xf32>
    %18 = vector.multi_reduction <add>, %17, %cst_12 [1] : vector<8x128xf32> to vector<8xf32>
    %19 = vector.shape_cast %18 : vector<8xf32> to vector<8x1xf32>
    %20 = vector.broadcast %19 : vector<8x1xf32> to vector<8x128xf32>
    %21 = arith.divf %17, %20 : vector<8x128xf32>
    %22 = vector.extract_strided_slice %21 {offsets = [0, 0], sizes = [8, 7], strides = [1, 1]} : vector<8x128xf32> to vector<8x7xf32>
    %c0_13 = arith.constant 0 : index
    %c0_14 = arith.constant 0 : index
    %23 = vector.load %arg6[%c0_13, %c0_14] : memref<8x7xf32, #tpu.memory_space<vmem>>, vector<8x7xf32>
    tpu.vector_store %arg6[%c0_13, %c0_14], %22 {strides = array<i32>} : memref<8x7xf32, #tpu.memory_space<vmem>>, vector<8x7xf32>,
    return
  }
  func.func @transform_0(%arg0: i32) -> (i32, i32) {
    %c0_i32 = arith.constant 0 : i32
    %c0_i32_0 = arith.constant 0 : i32
    return %arg0, %c0_i32 : i32, i32
  }
  func.func @transform_1(%arg0: i32) -> (i32, i32) {
    %c0_i32 = arith.constant 0 : i32
    %c0_i32_0 = arith.constant 0 : i32
    %c0_i32_1 = arith.constant 0 : i32
    return %c0_i32, %c0_i32_0 : i32, i32
  }
  func.func @transform_2(%arg0: i32) -> (i32, i32) {
    %c0_i32 = arith.constant 0 : i32
    %c0_i32_0 = arith.constant 0 : i32
    %c0_i32_1 = arith.constant 0 : i32
    return %c0_i32, %c0_i32_0 : i32, i32
  }
  func.func @transform_3(%arg0: i32) -> (i32, i32) {
    %c0_i32 = arith.constant 0 : i32
    %c0_i32_0 = arith.constant 0 : i32
    %c0_i32_1 = arith.constant 0 : i32
    return %c0_i32, %c0_i32_0 : i32, i32
  }
  func.func @transform_4(%arg0: i32) -> (i32, i32) {
    %c0_i32 = arith.constant 0 : i32
    %c0_i32_0 = arith.constant 0 : i32
    %c0_i32_1 = arith.constant 0 : i32
    return %c0_i32, %c0_i32_0 : i32, i32
  }
  func.func @transform_5(%arg0: i32) -> (i32, i32) {
    %c0_i32 = arith.constant 0 : i32
    %c0_i32_0 = arith.constant 0 : i32
    return %arg0, %c0_i32 : i32, i32
  }
}

</mosaic_0001>

<bundles_post_ra>
// kernel: fc_forward.1
= control target key start
LH: loop header
LB: loop body
LE: loop exit
PB: predicated region body
PF: predicated region fallthrough
CT: control target
= control target key end

     0   :  { %v354_v1 = vmov 0.0   ;;  %vm355_vm0 = vmmov 0   ;;  %s447_s0 = inlined_call_operand.vmem [shape: bf16[8,128], index: 0, kind: input, shape index: {}]   ;;  %s448_s1 = inlined_call_operand.vmem [shape: bf16[128,64], index: 1, kind: input, shape index: {}]   ;;  %s449_s2 = inlined_call_operand.vmem [shape: f32[1,64], index: 2, kind: input, shape index: {}]   ;;  %s450_s3 = inlined_call_operand.vmem [shape: f32[64,128], index: 3, kind: input, shape index: {}]   ;;  %s451_s4 = inlined_call_operand.vmem [shape: f32[1,128], index: 4, kind: input, shape index: {}]   ;;  %s452_s5 = inlined_call_operand.hbm [shape: f32[8,7], index: 5, kind: output, shape index: {}]  }
   0x1   :  { %v320_v0 = vld [vmem:[%s448_s1 + $0x38] sm:$0xff]   ;;  %278 = vmatprep.subr.bf16.mxu0 %v354_v1  ;;  %298 = vmatprep.subr.mxu1 %v354_v1  ;;  %v321_v2 = vld [vmem:[%s448_s1 + $0x30] sm:$0xff]   ;;  %v322_v3 = vld [vmem:[%s448_s1 + $0x28] sm:$0xff]  }
   0x2   :  { %279 = vmatpush3.bf16.msra.mxu0 %v320_v0  ;;  %294 = vmatprep.mubr.msk.bf16.mxu0 %vm355_vm0, %v354_v1  ;;  %v142_v4 = vld [vmem:[%s450_s3 + $0x38] sm:$0xff]  ;;  %v141_v5 = vld [vmem:[%s450_s3 + $0x30] sm:$0xff]  ;;  %v323_v6 = vld [vmem:[%s448_s1 + $0x20] sm:$0xff]  }
   0x3   :  { %280 = vmatprep.subr.bf16.mxu0 %v354_v1  ;;  %314 = vmatprep.mubr.msk.f32.mxu1 %vm355_vm0, %v354_v1  ;;  %v140_v7 = vld [vmem:[%s450_s3 + $0x28] sm:$0xff] }
   0x4   :  { %299 = vmatpush3.msra.mxu1 %v142_v4 }
   0x5   :  { %300 = vmatprep.subr.mxu1 %v354_v1 }
   0x6   :  { %281 = vmatpush3.bf16.msra.mxu0 %v321_v2 }
   0x7   :  { %282 = vmatprep.subr.bf16.mxu0 %v354_v1 }
   0xa   :  { %283 = vmatpush3.bf16.msra.mxu0 %v322_v3 }
   0xb   :  { %10 = vsyncpa [#allocation3], 0  ;;  %284 = vmatprep.subr.bf16.mxu0 %v354_v1  ;;  %301 = vmatpush3.msra.mxu1 %v141_v5  ;;  %v139_v8 = vld [vmem:[%s450_s3 + $0x20] sm:$0xff]  ;;  %v324_v9 = vld [vmem:[%s448_s1 + $0x18] sm:$0xff]   ;;  %vm150_vm1 = vcmask 523264   ;;  %vm233_vm2 = vcmask 56320  }
   0xc   :  { %302 = vmatprep.subr.mxu1 %v354_v1  ;;  %v138_v10 = vld [vmem:[%s450_s3 + $0x18] sm:$0xff]  ;;  %v325_v11 = vld [vmem:[%s448_s1 + $0x10] sm:$0xff]   ;;  %v326_v12 = vld [vmem:[%s448_s1 + $0x8] sm:$0xff]  }
   0xd   :  { %303 = vmatpush3.msra.mxu1 %v140_v7  ;;  %v327_v13 = vld [vmem:[%s448_s1] sm:$0xff]   ;;  %v137_v15 = vld [vmem:[%s450_s3 + $0x10] sm:$0xff]  ;;  %v136_v16 = vld [vmem:[%s450_s3 + $0x8] sm:$0xff] }
   0xe   :  { %285 = vmatpush3.bf16.msra.mxu0 %v323_v6  ;;  %304 = vmatprep.subr.mxu1 %v354_v1  ;;  %v22_v14 = vld [vmem:[%s447_s0] sm:$0xf] }
   0xf   :  { %286 = vmatprep.subr.bf16.mxu0 %v354_v1  ;;  %305 = vmatpush3.msra.mxu1 %v139_v8  ;;  %v135_v17 = vld [vmem:[%s450_s3] sm:$0xff] }
  0x10   :  { %306 = vmatprep.subr.mxu1 %v354_v1  ;;  %v249_v18 = vld [vmem:[%s449_s2] ss:$0 sm:$0xff]  ;;  %s356_s2 = smov [#allocation2]  }
  0x11   :  { %307 = vmatpush3.msra.mxu1 %v138_v10  ;;  %v258_v25 = vld [vmem:[%s451_s4] ss:$0 sm:$0xff]  ;;  %s241_s3 = sshll.u32 %s356_s2, 4  ;;  %s242_s3 = int_to_ptr.vmem [resolvable:$true] %s241_s3 }
  0x12   :  { %287 = vmatpush3.bf16.msra.mxu0 %v324_v9  ;;  %308 = vmatprep.subr.mxu1 %v354_v1  ;;  %s332_s4 = scalar_lea.vmem %s242_s3, 128  ;;  %p337_p1 = scmp.lt.s32.totalorder %s242_s3, %s242_s3 }
  0x13   :  { %288 = vmatprep.subr.bf16.mxu0 %v354_v1  ;;  %309 = vmatpush3.msra.mxu1 %v137_v15  ;;  %p333_p0 = scmp.ne.s32.totalorder %s242_s3, %s332_s4  ;;  %p338_p2 = scmp.lt.s32.totalorder %s332_s4, %s332_s4 }
  0x14   :  { %310 = vmatprep.subr.mxu1 %v354_v1 }
  0x15   :  { %311 = vmatpush3.msra.mxu1 %v136_v16  ;;  %p339_p3 = por %p338_p2, %p337_p1 }
  0x16   :  { %289 = vmatpush3.bf16.msra.mxu0 %v325_v11  ;;  %312 = vmatprep.subr.mxu1 %v354_v1 }
  0x17   :  { %290 = vmatprep.subr.bf16.mxu0 %v354_v1  ;;  %313 = vmatpush3.msra.mxu1 %v135_v17  ;;  %p340_p4 = pnand %p339_p3, %p333_p0 }
  0x1a   :  { %291 = vmatpush3.bf16.msra.mxu0 %v326_v12 }
  0x1b   :  { %292 = vmatprep.subr.bf16.mxu0 %v354_v1 }
  0x1e   :  { %293 = vmatpush3.bf16.msra.mxu0 %v327_v13 }
  0x21   :  { %295 = vmatmul.mubr.bf16.vlgmr.msra.gmra.mxu0 %v22_v14 }
  0xe1   :  { %v128_v19 = vpop.f32.mrf.mxu0 }
  0xe2   :  { %v129_v20 = vadd.f32 %v249_v18, %v128_v19 }
  0xe3   :  { %v296_v21 = vpop.f32.mrf.mxu0 }
  0xe4   :  { %v134_v22 = vmax.f32 %v129_v20, 0.0 }
  0xe5   :  { %v131_v23 = vpop.f32.mrf.mxu0 }
  0xe6   :  { %315 = vmatmul.mubr.msk.f32.vlgmr.msra.gmra.mxu1 %vm150_vm1, %v134_v22 }
  0xe7   :  { %v297_v24 = vpop.f32.mrf.mxu0 }
 0x1a6   :  { %v220_v26 = vpop.f32.mrf.mxu1 }
 0x1a7   :  { %v221_v27 = vadd.f32 %v258_v25, %v220_v26 }
 0x1a8   :  { %v316_v28 = vpop.f32.mrf.mxu1 }
 0x1a9   :  { %224 = vmax.xlane.f32.xlu0 %v221_v27 }
 0x232   :  { %v225_v29 = vpop.xlane.xlu0 %224 }
 0x233   :  { %v226_v30 = vsub.f32 %v221_v27, %v225_v29 }
 0x235   :  { %v227_v31 = vmul.f32 1.442695, %v226_v30 }
 0x237   :  { %328 = vpow2.f32 %v227_v31 }
 0x244   :  { %v329_v32 = vpop.eup %328 }
 0x245   :  { %229 = vadd.xlane.f32.xlu0 %v329_v32 }
 0x2ce   :  { %v230_v33 = vpop.xlane.xlu0 %229 }
 0x2cf   :  { %330 = vrcp.f32 %v230_v33 }
 0x2dc   :  { %v331_v34 = vpop.eup %330 }
 0x2dd   :  { %v232_v35 = vmul.f32 %v331_v34, %v329_v32 }
 0x2df   :  { %234 = vst.msk [vmem:[#allocation2] sm:$0xff] %vm233_vm2, %v232_v35 }
 0x2e0   :  { %343 = shalt.err (!%p340_p4)
}
 0x2e1   :  { %244 = dma.vmem_to_hbm [thread:$0]  %s242_s3, 128, %s452_s5, [#allocation3]  }
 0x2e2   :  { %352 = dma.done.wait [#allocation3], 128  }
 0x2e3   :  { %353 = vsyncadd [#allocation3], 4294967168 }
 0x2e4   :  { %248 = vsyncpa [#allocation3], 1 }

</bundles_post_ra>
